<compile_context>
chip_gen: v7x
topology: tpu7x:2x2x1
jax: 0.10.0
libtpu: 0.0.40
codegen_flags: <defaults>
</compile_context>

<pallas_src>
import jax
import jax.numpy as jnp
from jax.experimental import pallas as pl
from jax.experimental.pallas import tpu as pltpu


def _additive_prompt_kernel(x_ref, prompt_ref, o_ref):
    # x_ref:      (TB, CHW) lane-dense block of flattened images
    # prompt_ref: (1,  CHW) pre-fused program * mask (broadcast over rows)
    # o_ref:      (TB, CHW)
    o_ref[...] = (x_ref[...] + prompt_ref[...]).astype(o_ref.dtype)


def _choose_batch_tile(B, chw, itemsize, budget_bytes=4 << 20):
    """Pick rows-per-step so one x block is ~<= budget, honoring (8,128) rules."""
    row_bytes = max(1, chw * itemsize)
    tb = max(1, budget_bytes // row_bytes)
    if tb >= B:
        return B  # full batch in one block (block dim == full array dim)
    # second-to-last block dim must be a multiple of 8 when smaller than the
    # full extent
    tb = max(8, (tb // 8) * 8)
    return min(tb, B)


def additive_visual_prompt(x, program, mask):
    """x: (B, 3, S, S); program, mask: (3, S, S). Returns x + program * mask."""
    B, C, H, W = x.shape
    assert program.shape == (C, H, W) and mask.shape == (C, H, W)

    chw = C * H * W
    # Pre-fuse the prompt once (parameter * buffer product); cast to x's dtype
    # so the kernel moves the minimal number of bytes.
    prompt = (program * mask).astype(x.dtype).reshape(1, chw)
    # Free row-major view of NCHW -> lane-dense 2-D slab.
    x_flat = x.reshape(B, chw)

    tb = _choose_batch_tile(B, chw, jnp.dtype(x.dtype).itemsize)
    grid = (pl.cdiv(B, tb),)

    grid_spec = pltpu.PrefetchScalarGridSpec(
        num_scalar_prefetch=0,
        grid=grid,
        in_specs=[
            pl.BlockSpec((tb, chw), lambda b: (b, 0)),
            pl.BlockSpec((1, chw), lambda b: (0, 0)),
        ],
        out_specs=pl.BlockSpec((tb, chw), lambda b: (b, 0)),
    )

    out_flat = pl.pallas_call(
        _additive_prompt_kernel,
        out_shape=jax.ShapeDtypeStruct((B, chw), x.dtype),
        grid_spec=grid_spec,
        # Matches PyTorch in-place `x +=`; caller should donate x at the jit
        # boundary to actually reuse the buffer.
        input_output_aliases={0: 0},
        compiler_params=pltpu.CompilerParams(
            dimension_semantics=("parallel",),
        ),
    )(x_flat, prompt)

    return out_flat.reshape(B, C, H, W)


def make_prompt_params(size, pad, dtype=jnp.float32):
    """Deterministic parameter/buffer construction mirroring __init__."""
    if size > 2 * pad:
        inner = jnp.zeros((3, size - 2 * pad, size - 2 * pad), dtype=dtype)
        mask = jnp.pad(
            inner, ((0, 0), (pad, pad), (pad, pad)), constant_values=1.0
        )
    elif size == 2 * pad:
        mask = jnp.ones((3, size, size), dtype=dtype)
    else:
        raise ValueError("Pad Should Not Exceed Half Of Size")
    # nn.Parameter init is zeros; use a small deterministic nonzero value
    # instead so the kernel's effect is observable, seeded with PRNGKey(0).
    program = 0.01 * jax.random.normal(
        jax.random.PRNGKey(0), (3, size, size), dtype=dtype
    )
    return program, mask


if __name__ == "__main__":
    size, pad, batch = 16, 4, 2
    program, mask = make_prompt_params(size, pad)

    key = jax.random.PRNGKey(0)
    x = jax.random.normal(key, (batch, 3, size, size), dtype=jnp.float32)

    out = additive_visual_prompt(x, program, mask)
    out = jax.block_until_ready(out)

    # Reference check in plain JAX
    ref = x + program * mask
    assert out.shape == x.shape and out.dtype == x.dtype
    assert jnp.allclose(out, ref, atol=1e-6), "mismatch vs reference"

    print("KERNEL_OK")
</pallas_src>

<mosaic_0001>
module attributes {stable_mosaic.version = 11 : i64} {
  func.func @_additive_prompt_kernel(%arg0: i32, %arg1: memref<2x768xf32, #tpu.memory_space<vmem>>, %arg2: memref<1x768xf32, #tpu.memory_space<vmem>>, %arg3: memref<2x768xf32, #tpu.memory_space<vmem>>) attributes {dimension_semantics = [#tpu.dimension_semantics<parallel>], iteration_bounds = array<i64: 1>, scalar_prefetch = 0 : i64, scratch_operands = 0 : i64, tpu.core_type = #tpu.core_type<tc>, window_params = [{transform_indices = @transform_0, window_bounds = array<i64: 2, 768>}, {pipeline_mode = #tpu.pipeline_mode<synchronous>, transform_indices = @transform_1, window_bounds = array<i64: 1, 768>}, {transform_indices = @transform_2, window_bounds = array<i64: 2, 768>}]} {
    %c0 = arith.constant 0 : index
    %c0_0 = arith.constant 0 : index
    %0 = vector.load %arg1[%c0, %c0_0] : memref<2x768xf32, #tpu.memory_space<vmem>>, vector<2x768xf32>
    %c0_1 = arith.constant 0 : index
    %c0_2 = arith.constant 0 : index
    %1 = vector.load %arg2[%c0_1, %c0_2] : memref<1x768xf32, #tpu.memory_space<vmem>>, vector<1x768xf32>
    %2 = vector.broadcast %1 : vector<1x768xf32> to vector<2x768xf32>
    %3 = arith.addf %0, %2 : vector<2x768xf32>
    %c0_3 = arith.constant 0 : index
    %c0_4 = arith.constant 0 : index
    %4 = vector.load %arg3[%c0_3, %c0_4] : memref<2x768xf32, #tpu.memory_space<vmem>>, vector<2x768xf32>
    tpu.vector_store %arg3[%c0_3, %c0_4], %3 {strides = array<i32>} : memref<2x768xf32, #tpu.memory_space<vmem>>, vector<2x768xf32>,
    return
  }
  func.func @transform_0(%arg0: i32) -> (i32, i32) {
    %c0_i32 = arith.constant 0 : i32
    %c0_i32_0 = arith.constant 0 : i32
    return %arg0, %c0_i32 : i32, i32
  }
  func.func @transform_1(%arg0: i32) -> (i32, i32) {
    %c0_i32 = arith.constant 0 : i32
    %c0_i32_0 = arith.constant 0 : i32
    %c0_i32_1 = arith.constant 0 : i32
    return %c0_i32, %c0_i32_0 : i32, i32
  }
  func.func @transform_2(%arg0: i32) -> (i32, i32) {
    %c0_i32 = arith.constant 0 : i32
    %c0_i32_0 = arith.constant 0 : i32
    return %arg0, %c0_i32 : i32, i32
  }
}

</mosaic_0001>

<bundles_post_ra>
// kernel: tpu_custom_call.1
= control target key start
LH: loop header
LB: loop body
LE: loop exit
PB: predicated region body
PF: predicated region fallthrough
CT: control target
= control target key end

     0   :  { %7 = vsyncpa [#allocation3], 0  ;;  %s194_s0 = inlined_call_operand.hbm [shape: f32[2,768], index: 0, kind: input, shape index: {}, may-alias: {0,2}]   ;;  %s195_s1 = inlined_call_operand.vmem [shape: f32[1,768], index: 1, kind: input, shape index: {}]   ;;  %s196_s2 = inlined_call_operand.hbm [shape: f32[2,768], index: 2, kind: output, shape index: {}, may-alias: {0,2}]  }
   0x1   :  { %8 = vsyncpa [#allocation4], 0  ;;  %s149_s9 = smov [#allocation2]   ;;  %s101_s13 = scalar_lea.hbm %s194_s0, 192 }
   0x2   :  { %s15_s10 = sshll.u32 %s149_s9, 4  ;;  %p102_p0 = scmp.ne.s32.totalorder %s194_s0, %s101_s13  ;;  %s16_s10 = int_to_ptr.vmem [resolvable:$true] %s15_s10 }
   0x3   :  { %p105_p1 = scmp.lt.u32.totalorder %s101_s13, %s194_s0 }
   0x5   :  { %p107_p2 = pnand %p105_p1, %p102_p0 }
   0x7   :  { %110 = shalt.err (!%p107_p2)
}
   0x8   :  { %s111_s18 = scalar_lea.vmem %s16_s10, 192  ;;  %p116_p4 = scmp.lt.s32.totalorder %s16_s10, %s16_s10 }
   0x9   :  { %p112_p3 = scmp.ne.s32.totalorder %s16_s10, %s111_s18  ;;  %p117_p5 = scmp.lt.s32.totalorder %s111_s18, %s111_s18 }
   0xb   :  { %p118_p6 = por %p117_p5, %p116_p4 }
   0xd   :  { %p119_p7 = pnand %p118_p6, %p112_p3 }
   0xf   :  { %122 = shalt.err (!%p119_p7)
}
  0x10   :  { %18 = dma.hbm_to_vmem [thread:$0]  %s194_s0, 192, %s16_s10, [#allocation3]  }
  0x11   :  { %145 = dma.done.wait [#allocation3], 192  }
  0x12   :  { %146 = vsyncadd [#allocation3], 4294967104  ;;  %v28_v0 = vlaneseq  ;;  %v150_v1 = vmov 1983009808   ;;  %v26_v11 = vld [vmem:[%s195_s1] sm:$0x3f] }
  0x13   :  { %v55_v2 = vunpack.c.l.s4 %v150_v1  ;;  %v25_v24 = vld [vmem:[#allocation2 + $0x8] sm:$0xf]  ;;  %v24_v25 = vld [vmem:[#allocation2] sm:$0xff]  ;;  %s151_s0 = smov [#allocation5]  }
  0x14   :  { %v29_v3 = vshrl.u32 %v28_v0, 7  ;;  %s89_s23 = sshll.u32 %s151_s0, 4  ;;  %s90_s23 = int_to_ptr.vmem [resolvable:$true] %s89_s23 }
  0x15   :  { %v56_v4 = vunpack.c.0.s8 %v55_v2  ;;  %s123_s1 = scalar_lea.vmem %s90_s23, 192  ;;  %p128_p9 = scmp.lt.s32.totalorder %s90_s23, %s90_s23 }
  0x16   :  { %v30_v5 = vsub.s32 0, %v29_v3  ;;  %v34_v6 = vsub.s32 1, %v29_v3  ;;  %v38_v7 = vsub.s32 2, %v29_v3  ;;  %v42_v8 = vsub.s32 3, %v29_v3  ;;  %p124_p8 = scmp.ne.s32.totalorder %s90_s23, %s123_s1  ;;  %p129_p10 = scmp.lt.s32.totalorder %s123_s1, %s123_s1 }
  0x17   :  { %v46_v9 = vsub.s32 4, %v29_v3  ;;  %v50_v10 = vsub.s32 5, %v29_v3  ;;  %v59_v12 = vsub.s32 %v56_v4, %v29_v3 }
  0x18   :  { %v31_v13 = vrot.slane %v26_v11, %v30_v5  ;;  %v35_v14 = vrot.slane %v26_v11, %v34_v6  ;;  %v39_v15 = vrot.slane %v26_v11, %v38_v7  ;;  %v43_v16 = vrot.slane %v26_v11, %v42_v8  ;;  %p130_p11 = por %p129_p10, %p128_p9 }
  0x19   :  { %v47_v17 = vrot.slane %v26_v11, %v46_v9  ;;  %v51_v18 = vrot.slane %v26_v11, %v50_v10 }
  0x1a   :  { %v52_v19 = vcombine.low %v31_v13, %v35_v14  ;;  %v53_v20 = vcombine.low %v39_v15, %v43_v16  ;;  %p131_p12 = pnand %p130_p11, %p124_p8 }
  0x1b   :  { %v69_v21 = vcombine.low %v47_v17, %v51_v18 }
  0x1c   :  { %v60_v22 = vrot.slane %v52_v19, %v59_v12  ;;  %v67_v23 = vrot.slane %v53_v20, %v59_v12 }
  0x1d   :  { %v76_v26 = vrot.slane %v69_v21, %v59_v12 }
  0x1e   :  { %v68_v27 = vcombine.low %v60_v22, %v67_v23 }
  0x1f   :  { %v80_v28 = vadd.f32 %v76_v26, %v25_v24 }
  0x20   :  { %v79_v29 = vadd.f32 %v68_v27, %v24_v25 }
  0x21   :  { %82 = vst [vmem:[#allocation5 + $0x8] sm:$0xf] %v80_v28 }
  0x22   :  { %81 = vst [vmem:[#allocation5] sm:$0xff] %v79_v29 }
  0x23   :  { %134 = shalt.err (!%p131_p12)
}
  0x24   :  { %s135_s26 = scalar_lea.hbm %s196_s2, 192 }
  0x25   :  { %p136_p13 = scmp.ne.s32.totalorder %s196_s2, %s135_s26  ;;  %p139_p0 = scmp.lt.u32.totalorder %s135_s26, %s196_s2 }
  0x27   :  { %p141_p1 = pnand %p139_p0, %p136_p13 }
  0x29   :  { %144 = shalt.err (!%p141_p1)
}
  0x2a   :  { %92 = dma.vmem_to_hbm [thread:$0]  %s90_s23, 192, %s196_s2, [#allocation4]  }
  0x2b   :  { %147 = dma.done.wait [#allocation4], 192  }
  0x2c   :  { %148 = vsyncadd [#allocation4], 4294967104 }
  0x2d   :  { %96 = vsyncpa [#allocation3], 1 }
  0x2e   :  { %97 = vsyncpa [#allocation4], 1 }

</bundles_post_ra>
